<compile_context>
chip_gen: v5e
topology: v5e:2x2
jax: 0.10.0
libtpu: 0.0.40
codegen_flags: <defaults>
</compile_context>

<pallas_src>
import functools
import math

import numpy as np
import jax
import jax.numpy as jnp
from jax.experimental import pallas as pl
from jax.experimental.pallas import tpu as pltpu


def _round_up(x, m):
    return (x + m - 1) // m * m


# ----------------------------------------------------------------------------
# Pallas kernels
# ----------------------------------------------------------------------------

def _linear_kernel(x_ref, w_ref, b_ref, o_ref):
    # x: (tm, Din) bf16, w: (Din, Dout) bf16, b: (1, Dout) f32
    o_ref[...] = (
        jnp.dot(x_ref[...], w_ref[...], preferred_element_type=jnp.float32)
        + b_ref[...]
    )


def linear(x, w_bf16, b_row, *, tile_m=256):
    """y = x @ w + b for x of shape (..., Din); rows tiled over a parallel grid."""
    lead = x.shape[:-1]
    din = x.shape[-1]
    dout = w_bf16.shape[1]
    x2 = x.reshape(-1, din).astype(jnp.bfloat16)
    m = x2.shape[0]
    tm = min(tile_m, _round_up(m, 16))
    mp = _round_up(m, tm)
    if mp != m:
        x2 = jnp.pad(x2, ((0, mp - m), (0, 0)))
    out = pl.pallas_call(
        _linear_kernel,
        out_shape=jax.ShapeDtypeStruct((mp, dout), jnp.float32),
        grid_spec=pltpu.PrefetchScalarGridSpec(
            num_scalar_prefetch=0,
            grid=(mp // tm,),
            in_specs=[
                pl.BlockSpec((tm, din), lambda i: (i, 0)),
                pl.BlockSpec((din, dout), lambda i: (0, 0)),
                pl.BlockSpec((1, dout), lambda i: (0, 0)),
            ],
            out_specs=pl.BlockSpec((tm, dout), lambda i: (i, 0)),
        ),
        compiler_params=pltpu.CompilerParams(dimension_semantics=("parallel",)),
    )(x2, w_bf16, b_row)
    if mp != m:
        out = out[:m]
    return out.reshape(*lead, dout)


def _mask_gen_attn_kernel(q_ref, kv_ref, kmask_ref, w_ref, b_ref, o_ref):
    # q: (1, 1, H) bf16 (pre-scaled by 1/sqrt(H)); kv: (1, Lf, H) bf16 (K and V)
    q = q_ref[0]                                  # (1, H)
    kv = kv_ref[0]                                # (Lf, H)
    kmask = kmask_ref[0]                          # (1, Lf) f32
    s = jax.lax.dot_general(q, kv, (((1,), (1,)), ((), ())),
                            preferred_element_type=jnp.float32)    # (1, Lf)
    s = jnp.where(kmask > 0.5, s, -1e30)
    s = s - jnp.max(s, axis=-1, keepdims=True)
    p = jnp.exp(s) * kmask
    denom = jnp.sum(p, axis=-1, keepdims=True) + 1e-9
    p = p * pl.reciprocal(denom, approx=True)
    h = jnp.dot(p.astype(jnp.bfloat16), kv,
                preferred_element_type=jnp.float32)                # (1, H)
    g = jnp.dot(h.astype(jnp.bfloat16), w_ref[...],
                preferred_element_type=jnp.float32) + b_ref[...]   # (1, Gp)
    o_ref[0] = jax.nn.sigmoid(g)


def mask_gen_attention(q_last, frames_kv, frames_mask, prep):
    """First decoder pass fused with sigmoid(fc_mask_gen(h[:, -1]))."""
    B, _, H = q_last.shape
    Lf = frames_kv.shape[1]
    gp = prep["fc_mask_gen_w"].shape[1]          # padded to a multiple of 128
    fmask3 = frames_mask.reshape(B, 1, Lf).astype(jnp.float32)
    out = pl.pallas_call(
        _mask_gen_attn_kernel,
        out_shape=jax.ShapeDtypeStruct((B, 1, gp), jnp.float32),
        grid_spec=pltpu.PrefetchScalarGridSpec(
            num_scalar_prefetch=0,
            grid=(B,),
            in_specs=[
                pl.BlockSpec((1, 1, H), lambda b: (b, 0, 0)),
                pl.BlockSpec((1, Lf, H), lambda b: (b, 0, 0)),
                pl.BlockSpec((1, 1, Lf), lambda b: (b, 0, 0)),
                pl.BlockSpec((H, gp), lambda b: (0, 0)),
                pl.BlockSpec((1, gp), lambda b: (0, 0)),
            ],
            out_specs=pl.BlockSpec((1, 1, gp), lambda b: (b, 0, 0)),
        ),
        compiler_params=pltpu.CompilerParams(dimension_semantics=("parallel",)),
    )(q_last, frames_kv, fmask3, prep["fc_mask_gen_w"], prep["fc_mask_gen_b"])
    return out[:, 0, :2]                          # (B, 2)


def _fused_rec_attn_kernel(q_ref, kv_ref, kmask_ref, gw_ref, w_rec_ref, b_rec_ref,
                           *out_refs, use_negative):
    # q: (1, Lq, H) bf16 (pre-scaled); kv: (1, Lk, H) bf16 (keys AND values)
    q = q_ref[0]                                  # (Lq, H)
    kv = kv_ref[0]                                # (Lk, H)
    kmask = kmask_ref[0]                          # (1, Lk) f32
    gw = gw_ref[0]                                # (1, Lk) f32
    w_rec = w_rec_ref[...]                        # (H, Vp) bf16
    b_rec = b_rec_ref[...]                        # (1, Vp) f32

    # Scores computed ONCE, shared by positive / hard-neg / easy-neg branches.
    s = jax.lax.dot_general(q, kv, (((1,), (1,)), ((), ())),
                            preferred_element_type=jnp.float32)    # (Lq, Lk)
    s = jnp.where(kmask > 0.5, s, -1e30)
    s = s - jnp.max(s, axis=-1, keepdims=True)
    p_base = jnp.exp(s) * kmask

    def branch(weight):
        p = p_base * weight
        denom = jnp.sum(p, axis=-1, keepdims=True) + 1e-9
        p = p * pl.reciprocal(denom, approx=True)
        h = jnp.dot(p.astype(jnp.bfloat16), kv,
                    preferred_element_type=jnp.float32)            # (Lq, H)
        logit = jnp.dot(h.astype(jnp.bfloat16), w_rec,
                        preferred_element_type=jnp.float32) + b_rec  # (Lq, Vp)
        return p, logit

    if use_negative:
        pos_ref, attn_ref, hard_ref, easy_ref = out_refs
    else:
        pos_ref, attn_ref = out_refs

    p_pos, pos_logit = branch(gw)
    pos_ref[0] = pos_logit
    attn_ref[0] = p_pos

    if use_negative:
        _, hard_logit = branch(jnp.ones_like(gw))
        hard_ref[0] = hard_logit
        _, easy_logit = branch(1.0 - gw)
        easy_ref[0] = easy_logit


def fused_rec_attention(q, kv, kmask, gauss_weight, prep, use_negative):
    """Positive (+ optional hard/easy negative) attention + fc_rec, one launch."""
    B, Lq, H = q.shape
    Lk = kv.shape[1]
    V = prep["vocab_size"]
    Vp = prep["fc_rec_w"].shape[1]
    kmask3 = kmask.reshape(B, 1, Lk).astype(jnp.float32)
    gw3 = gauss_weight.reshape(B, 1, Lk).astype(jnp.float32)

    out_shapes = [
        jax.ShapeDtypeStruct((B, Lq, Vp), jnp.float32),  # positive logits (padded)
        jax.ShapeDtypeStruct((B, Lq, Lk), jnp.float32),  # attention weights
    ]
    out_specs = [
        pl.BlockSpec((1, Lq, Vp), lambda b: (b, 0, 0)),
        pl.BlockSpec((1, Lq, Lk), lambda b: (b, 0, 0)),
    ]
    if use_negative:
        out_shapes += [jax.ShapeDtypeStruct((B, Lq, Vp), jnp.float32),
                       jax.ShapeDtypeStruct((B, Lq, Vp), jnp.float32)]
        out_specs += [pl.BlockSpec((1, Lq, Vp), lambda b: (b, 0, 0)),
                      pl.BlockSpec((1, Lq, Vp), lambda b: (b, 0, 0))]

    outs = pl.pallas_call(
        functools.partial(_fused_rec_attn_kernel, use_negative=use_negative),
        out_shape=tuple(out_shapes),
        grid_spec=pltpu.PrefetchScalarGridSpec(
            num_scalar_prefetch=0,
            grid=(B,),
            in_specs=[
                pl.BlockSpec((1, Lq, H), lambda b: (b, 0, 0)),
                pl.BlockSpec((1, Lk, H), lambda b: (b, 0, 0)),
                pl.BlockSpec((1, 1, Lk), lambda b: (b, 0, 0)),
                pl.BlockSpec((1, 1, Lk), lambda b: (b, 0, 0)),
                pl.BlockSpec((H, Vp), lambda b: (0, 0)),
                pl.BlockSpec((1, Vp), lambda b: (0, 0)),
            ],
            out_specs=tuple(out_specs),
        ),
        compiler_params=pltpu.CompilerParams(dimension_semantics=("parallel",)),
    )(q, kv, kmask3, gw3, prep["fc_rec_w"], prep["fc_rec_b"])

    if use_negative:
        pos_logit, attn, hard_logit, easy_logit = outs
        return pos_logit[..., :V], attn, hard_logit[..., :V], easy_logit[..., :V]
    pos_logit, attn = outs
    return pos_logit[..., :V], attn, None, None


# ----------------------------------------------------------------------------
# Plain-JAX glue (matches the PyTorch host-side code)
# ----------------------------------------------------------------------------

def sinusoidal_pos_emb(num_embeddings, embedding_dim, padding_idx=0):
    half = embedding_dim // 2
    scale = math.log(10000) / (half - 1)
    freq = jnp.exp(jnp.arange(half, dtype=jnp.float32) * -scale)
    emb = jnp.arange(num_embeddings, dtype=jnp.float32)[:, None] * freq[None, :]
    emb = jnp.concatenate([jnp.sin(emb), jnp.cos(emb)], axis=1)
    if embedding_dim % 2 == 1:
        emb = jnp.concatenate([emb, jnp.zeros((num_embeddings, 1))], axis=1)
    if padding_idx is not None:
        emb = emb.at[padding_idx].set(0.0)
    return emb


def generate_mask(seq_len, lengths):
    return (jnp.arange(seq_len)[None, :] < lengths[:, None]).astype(jnp.float32)


def mask_words(words_h, words_len, prep, weights=None):
    """Random word masking. Host-side numpy RNG, as in the original (np.random)."""
    B, Lw, H = words_h.shape
    # Tiny (1 x Din) @ (Din x H) — not worth a pallas_call launch.
    token = prep["mask_vec"][None, :] @ prep["word_fc_w_f32"] + prep["word_fc_b"]
    rng = np.random.RandomState(0)
    masked = np.zeros((B, Lw), dtype=np.float32)
    words_len_np = np.asarray(words_len)
    for i in range(B):
        l = int(words_len_np[i])
        num_masked = max(l // 3, 1)
        p = np.asarray(weights)[i, :l] if weights is not None else None
        choices = rng.choice(np.arange(1, l + 1), num_masked, replace=False, p=p)
        masked[i, choices] = 1.0
    masked = jnp.asarray(masked)[..., None]                  # (B, Lw, 1)
    masked_vec = jnp.where(masked == 0, 0.0, token[None, :, :])
    words_feat1 = jnp.where(masked == 1, 0.0, words_h) + masked_vec
    return words_feat1, masked


# ----------------------------------------------------------------------------
# Parameter preparation (hoisted casts / padding — done once)
# ----------------------------------------------------------------------------

def prepare_params(params):
    hidden = params["frame_fc_w"].shape[1]
    vocab = params["fc_rec_w"].shape[1]
    vp = _round_up(vocab, 128)
    gp = 128  # fc_mask_gen output width padded for lane-dense stores
    fc_rec_w = jnp.pad(params["fc_rec_w"], ((0, 0), (0, vp - vocab)))
    fc_rec_b = jnp.pad(params["fc_rec_b"], ((0, vp - vocab),))
    fc_gen_w = jnp.pad(params["fc_mask_gen_w"], ((0, 0), (0, gp - 2)))
    fc_gen_b = jnp.pad(params["fc_mask_gen_b"], ((0, gp - 2),))
    return {
        "hidden": hidden,
        "vocab_size": vocab,
        "frame_fc_w": params["frame_fc_w"].astype(jnp.bfloat16),
        "frame_fc_b": params["frame_fc_b"].reshape(1, -1).astype(jnp.float32),
        "word_fc_w": params["word_fc_w"].astype(jnp.bfloat16),
        "word_fc_w_f32": params["word_fc_w"].astype(jnp.float32),
        "word_fc_b": params["word_fc_b"].reshape(1, -1).astype(jnp.float32),
        "fc_rec_w": fc_rec_w.astype(jnp.bfloat16),
        "fc_rec_b": fc_rec_b.reshape(1, -1).astype(jnp.float32),
        "fc_mask_gen_w": fc_gen_w.astype(jnp.bfloat16),
        "fc_mask_gen_b": fc_gen_b.reshape(1, -1).astype(jnp.float32),
        "mask_vec": params["mask_vec"].astype(jnp.float32),
        "start_vec": params["start_vec"].astype(jnp.float32),
    }


# ----------------------------------------------------------------------------
# CNM forward
# ----------------------------------------------------------------------------

def cnm_forward(prep, frames_feat, frames_len, words_id, words_feat, words_len,
                weights=None, training=True, alpha=1.0, max_width=1.0,
                use_negative=True):
    bsz, n_frames, _ = frames_feat.shape
    _, n_words, _ = words_feat.shape
    hidden = prep["hidden"]
    scale = 1.0 / math.sqrt(hidden)

    # TODO(synk): stochastic dropout not implemented; run with dropout p = 0.
    frames_h = linear(frames_feat, prep["frame_fc_w"], prep["frame_fc_b"])
    frames_mask = generate_mask(n_frames, frames_len)

    words_feat = words_feat.at[:, 0].set(prep["start_vec"])
    words_pos = sinusoidal_pos_emb(n_words, hidden, padding_idx=0)[None]   # (1, Lw, H)
    words_h = linear(words_feat, prep["word_fc_w"], prep["word_fc_b"])
    words_mask = generate_mask(n_words, words_len + 1)

    # Cast once; frames serve as both K and V in every attention call.
    frames_kv = frames_h.astype(jnp.bfloat16)

    # First decoder pass: only h[:, -1] feeds fc_mask_gen, so compute only that
    # query row; fc_mask_gen + sigmoid are fused into the kernel.
    # TODO(synk): DualTransformer is a single-layer masked cross-attention stub;
    #             the query-side mask (words_mask) is not applied.
    q_last = ((words_h[:, -1:, :] + words_pos[:, -1:, :]) * scale).astype(jnp.bfloat16)
    gauss_param = mask_gen_attention(q_last, frames_kv, frames_mask, prep)   # (B, 2)
    gauss_center = gauss_param[:, 0]
    gauss_width = gauss_param[:, 1] * max_width

    if not training:
        return {"width": gauss_width, "center": gauss_center}

    props_len = n_frames // 4
    keep_idx = jnp.linspace(0, n_frames - 1, props_len).astype(jnp.int32)
    props_kv = frames_kv[:, keep_idx]                 # bf16 (B, Lk, H)
    props_mask = frames_mask[:, keep_idx]

    # generate_gauss_weight: a handful of VPU/EUP ops — plain JAX (a dedicated
    # pallas_call launch would cost more than the compute).
    pos = jnp.linspace(0.0, 1.0, props_len, dtype=jnp.float32)[None, :]
    center = gauss_center[:, None]
    width = jnp.maximum(gauss_width, 0.1)[:, None]
    gauss_weight = jnp.exp(-alpha * (pos - center) ** 2 / (width * width))   # (B, Lk)

    words_feat1, _ = mask_words(words_h, words_len, prep, weights=weights)
    words_feat1 = (words_feat1 + words_pos)[:, :-1]
    words_mask1 = words_mask[:, :-1]

    # Fused positive + hard-neg + easy-neg attention with fc_rec epilogue.
    q = (words_feat1 * scale).astype(jnp.bfloat16)    # (B, Lq, H)
    (words_logit, attn_weight,
     hard_neg_words_logit, easy_neg_words_logit) = fused_rec_attention(
        q, props_kv, props_mask, gauss_weight, prep, use_negative)

    return {
        "hard_neg_words_logit": hard_neg_words_logit,
        "easy_neg_words_logit": easy_neg_words_logit,
        "words_logit": words_logit,
        "words_id": words_id,
        "weights": None,
        "words_mask": words_mask1,
        "width": gauss_width,
        "center": gauss_center,
        "gauss_weight": gauss_weight,
        "attn_weight": attn_weight,
    }


def init_params(key, frames_in, words_in, hidden, vocab):
    ks = jax.random.split(key, 4)
    s = 0.05
    return {
        "frame_fc_w": jax.random.normal(ks[0], (frames_in, hidden), jnp.float32) * s,
        "frame_fc_b": jnp.zeros((hidden,), jnp.float32),
        "word_fc_w": jax.random.normal(ks[1], (words_in, hidden), jnp.float32) * s,
        "word_fc_b": jnp.zeros((hidden,), jnp.float32),
        "fc_rec_w": jax.random.normal(ks[2], (hidden, vocab), jnp.float32) * s,
        "fc_rec_b": jnp.zeros((vocab,), jnp.float32),
        "fc_mask_gen_w": jax.random.normal(ks[3], (hidden, 2), jnp.float32) * s,
        "fc_mask_gen_b": jnp.zeros((2,), jnp.float32),
        # module __init__ initializes these to zeros
        "mask_vec": jnp.zeros((words_in,), jnp.float32),
        "start_vec": jnp.zeros((words_in,), jnp.float32),
    }


if __name__ == "__main__":
    B, N_FRAMES, FRAMES_IN, WORDS_IN, HIDDEN, VOCAB, N_WORDS = 2, 16, 32, 32, 32, 50, 8

    key = jax.random.PRNGKey(0)
    kp, kf, kw, ki = jax.random.split(key, 4)

    raw_params = init_params(kp, FRAMES_IN, WORDS_IN, HIDDEN, VOCAB)
    params = prepare_params(raw_params)          # casts / padding hoisted, done once

    frames_feat = jax.random.normal(kf, (B, N_FRAMES, FRAMES_IN), jnp.float32)
    words_feat = jax.random.normal(kw, (B, N_WORDS, WORDS_IN), jnp.float32)
    words_id = jax.random.randint(ki, (B, N_WORDS), 0, VOCAB)
    frames_len = jnp.array([16, 12], dtype=jnp.int32)
    words_len = jnp.array([5, 6], dtype=jnp.int32)

    out = cnm_forward(params, frames_feat, frames_len, words_id, words_feat,
                      words_len, weights=None, training=True,
                      alpha=1.0, max_width=1.0, use_negative=True)

    for leaf in jax.tree_util.tree_leaves(out):
        if isinstance(leaf, jax.Array):
            leaf.block_until_ready()

    assert out["words_logit"].shape == (B, N_WORDS - 1, VOCAB)
    assert out["hard_neg_words_logit"].shape == (B, N_WORDS - 1, VOCAB)
    assert out["easy_neg_words_logit"].shape == (B, N_WORDS - 1, VOCAB)
    assert out["gauss_weight"].shape == (B, N_FRAMES // 4)
    assert out["attn_weight"].shape == (B, N_WORDS - 1, N_FRAMES // 4)
    print("KERNEL_OK")
</pallas_src>

<mosaic_0001>
module attributes {stable_mosaic.version = 11 : i64} {
  func.func @_linear_kernel(%arg0: i32, %arg1: memref<32x32xbf16, #tpu.memory_space<vmem>>, %arg2: memref<32x32xbf16, #tpu.memory_space<vmem>>, %arg3: memref<1x32xf32, #tpu.memory_space<vmem>>, %arg4: memref<32x32xf32, #tpu.memory_space<vmem>>) attributes {dimension_semantics = [#tpu.dimension_semantics<parallel>], iteration_bounds = array<i64: 1>, scalar_prefetch = 0 : i64, scratch_operands = 0 : i64, tpu.core_type = #tpu.core_type<tc>, window_params = [{transform_indices = @transform_0, window_bounds = array<i64: 32, 32>}, {pipeline_mode = #tpu.pipeline_mode<synchronous>, transform_indices = @transform_1, window_bounds = array<i64: 32, 32>}, {pipeline_mode = #tpu.pipeline_mode<synchronous>, transform_indices = @transform_2, window_bounds = array<i64: 1, 32>}, {transform_indices = @transform_3, window_bounds = array<i64: 32, 32>}]} {
    %c0 = arith.constant 0 : index
    %c0_0 = arith.constant 0 : index
    %0 = vector.load %arg1[%c0, %c0_0] : memref<32x32xbf16, #tpu.memory_space<vmem>>, vector<32x32xbf16>
    %c0_1 = arith.constant 0 : index
    %c0_2 = arith.constant 0 : index
    %1 = vector.load %arg2[%c0_1, %c0_2] : memref<32x32xbf16, #tpu.memory_space<vmem>>, vector<32x32xbf16>
    %cst = arith.constant dense<0.000000e+00> : vector<32x32xf32>
    %2 = tpu.matmul %0, %1, %cst {dimension_numbers = #tpu.dot_dimension_numbers<[1], [0], [0], [1], [0, 0, 1, 1], [], []>} : vector<32x32xbf16>, vector<32x32xbf16>, vector<32x32xf32> -> vector<32x32xf32>
    %c0_3 = arith.constant 0 : index
    %c0_4 = arith.constant 0 : index
    %3 = vector.load %arg3[%c0_3, %c0_4] : memref<1x32xf32, #tpu.memory_space<vmem>>, vector<1x32xf32>
    %4 = vector.broadcast %3 : vector<1x32xf32> to vector<32x32xf32>
    %5 = arith.addf %2, %4 : vector<32x32xf32>
    %c0_5 = arith.constant 0 : index
    %c0_6 = arith.constant 0 : index
    %6 = vector.load %arg4[%c0_5, %c0_6] : memref<32x32xf32, #tpu.memory_space<vmem>>, vector<32x32xf32>
    tpu.vector_store %arg4[%c0_5, %c0_6], %5 {strides = array<i32>} : memref<32x32xf32, #tpu.memory_space<vmem>>, vector<32x32xf32>,
    return
  }
  func.func @transform_0(%arg0: i32) -> (i32, i32) {
    %c0_i32 = arith.constant 0 : i32
    %c0_i32_0 = arith.constant 0 : i32
    return %arg0, %c0_i32 : i32, i32
  }
  func.func @transform_1(%arg0: i32) -> (i32, i32) {
    %c0_i32 = arith.constant 0 : i32
    %c0_i32_0 = arith.constant 0 : i32
    %c0_i32_1 = arith.constant 0 : i32
    return %c0_i32, %c0_i32_0 : i32, i32
  }
  func.func @transform_2(%arg0: i32) -> (i32, i32) {
    %c0_i32 = arith.constant 0 : i32
    %c0_i32_0 = arith.constant 0 : i32
    %c0_i32_1 = arith.constant 0 : i32
    return %c0_i32, %c0_i32_0 : i32, i32
  }
  func.func @transform_3(%arg0: i32) -> (i32, i32) {
    %c0_i32 = arith.constant 0 : i32
    %c0_i32_0 = arith.constant 0 : i32
    return %arg0, %c0_i32 : i32, i32
  }
}

</mosaic_0001>

<bundles_post_ra>
// kernel: tpu_custom_call.1
= control target key start
LH: loop header
LB: loop body
LE: loop exit
PB: predicated region body
PF: predicated region fallthrough
CT: control target
= control target key end

     0   :  { %8 = vsyncpa [#allocation3], 0  ;;  %s287_s0 = inlined_call_operand.hbm [shape: bf16[32,32], index: 0, kind: input, shape index: {}]   ;;  %s288_s1 = inlined_call_operand.hbm [shape: bf16[32,32], index: 1, kind: input, shape index: {}]   ;;  %s289_s2 = inlined_call_operand.vmem [shape: f32[1,32], index: 2, kind: input, shape index: {}]   ;;  %s290_s3 = inlined_call_operand.hbm [shape: f32[32,32], index: 3, kind: output, shape index: {}]  }
   0x1   :  { %9 = vsyncpa [#allocation6], 0 }
   0x2   :  { %10 = vsyncpa [#allocation4], 0  ;;  %s15_s14 = sshll.u32 %s287_s0, 4  ;;  %s242_s15 = smov [#allocation2]   ;;  %s16_s14 = int_to_ptr.hbm [resolvable:$true] %s15_s14 }
   0x3   :  { %s17_s16 = sshll.u32 %s242_s15, 4  ;;  %s28_s19 = sshll.u32 %s288_s1, 4  ;;  %s18_s16 = int_to_ptr.vmem [resolvable:$true] %s17_s16  ;;  %s29_s19 = int_to_ptr.hbm [resolvable:$true] %s28_s19 }
   0x4   :  { %s243_s20 = smov 64   ;;  %s244_s21 = smov 4  }
   0x5   :  { %23 = dma.hbm_to_vmem [thread:$0]  %s16_s14, 256, %s18_s16, [#allocation3], %s243_s20, %s243_s20, %s244_s21  }
   0x6   :  { %s245_s22 = smov [#allocation5]  }
   0x7   :  { %s30_s23 = sshll.u32 %s245_s22, 4  ;;  %s31_s23 = int_to_ptr.vmem [resolvable:$true] %s30_s23 }
   0x8   :  { %36 = dma.hbm_to_vmem [thread:$0]  %s29_s19, 256, %s31_s23, [#allocation6], %s243_s20, %s243_s20, %s244_s21  }
   0x9   :  { %236 = dma.done.wait [#allocation3], 256  }
   0xa   :  { %237 = vsyncadd [#allocation3], 4294967040 }
   0xb   :  { %238 = dma.done.wait [#allocation6], 256  }
   0xc   :  { %239 = vsyncadd [#allocation6], 4294967040  ;;  %v153_v0 = vld [vmem:[#allocation5 + $0x8] sm:$0xff]  ;;  %v152_v1 = vld [vmem:[#allocation5] sm:$0xff]  ;;  %vm82_vm0 = vcmask 261120   ;;  %s246_s24 = smov [#allocation7]  }
   0xd   :  { %95 = vmatpush.bf16.msra.mxu0 %v153_v0  ;;  %154 = vmatpush.bf16.msra.mxu1 %v153_v0  ;;  %v150_v2 = vld [vmem:[#allocation2] sm:$0xff]  ;;  %v151_v3 = vld [vmem:[#allocation2 + $0x8] sm:$0xff]  ;;  %s116_s25 = sshll.u32 %s246_s24, 4  ;;  %s118_s28 = sshll.u32 %s290_s3, 4  ;;  %s117_s25 = int_to_ptr.vmem [resolvable:$true] %s116_s25  ;;  %s119_s28 = int_to_ptr.hbm [resolvable:$true] %s118_s28 }
   0xe   :  { %v163_v4 = vld [vmem:[%s289_s2] ss:$0 sm:$0xff]  ;;  %s247_s2 = smov 128   ;;  %s248_s29 = smov 8  }
  0x11   :  { %96 = vmatpush.bf16.msra.mxu0 %v152_v1  ;;  %155 = vmatpush.bf16.msra.mxu1 %v152_v1 }
  0x14   :  { %148 = vmatmul.msk.bf16.vlgmr.msra.gmra.mxu0 %vm82_vm0, %v150_v2  ;;  %149 = vmatmul.msk.bf16.vlgmr.msra.gmra.mxu1 %vm82_vm0, %v151_v3 }
  0x91   :  { %v98_v5 = vpop.f32.mrf.mxu0  ;;  %v103_v6 = vpop.f32.mrf.mxu1 }
  0x92   :  { %v99_v7 = vadd.f32 %v163_v4, %v98_v5  ;;  %v104_v8 = vadd.f32 %v163_v4, %v103_v6 }
  0x94   :  { %108 = vst.msk [vmem:[#allocation7] sm:$0xff] %vm82_vm0, %v99_v7 }
  0x95   :  { %110 = vst.msk [vmem:[#allocation7 + $0x10] sm:$0xff] %vm82_vm0, %v104_v8 }
  0x99   :  { %v100_v9 = vpop.f32.mrf.mxu0  ;;  %v105_v10 = vpop.f32.mrf.mxu1 }
  0x9a   :  { %v101_v11 = vadd.f32 %v163_v4, %v100_v9  ;;  %v106_v12 = vadd.f32 %v163_v4, %v105_v10 }
  0x9c   :  { %109 = vst.msk [vmem:[#allocation7 + $0x8] sm:$0xff] %vm82_vm0, %v101_v11 }
  0x9d   :  { %111 = vst.msk [vmem:[#allocation7 + $0x18] sm:$0xff] %vm82_vm0, %v106_v12 }
  0x9e   :  { %124 = dma.vmem_to_hbm [thread:$0]  %s117_s25, 512, %s119_s28, [#allocation4], %s247_s2, %s247_s2, %s248_s29  }
  0x9f   :  { %240 = dma.done.wait [#allocation4], 512  }
  0xa0   :  { %241 = vsyncadd [#allocation4], 4294966784 }
  0xa1   :  { %129 = vsyncpa [#allocation3], 1 }
  0xa2   :  { %130 = vsyncpa [#allocation6], 1 }
  0xa3   :  { %131 = vsyncpa [#allocation4], 1 }

</bundles_post_ra>
